<compile_context>
chip_gen: v7x
topology: tpu7x:2x2x1
jax: 0.10.0
libtpu: 0.0.40
codegen_flags: <defaults>
</compile_context>

<pallas_src>
import functools

import jax
import jax.numpy as jnp
from jax import lax
from jax.experimental import pallas as pl
from jax.experimental.pallas import tpu as pltpu


def _round_up(v, mult):
    return (v + mult - 1) // mult * mult


def _vmem_capacity_bytes():
    try:
        return int(pltpu.get_tpu_info().vmem_capacity_bytes)
    except Exception:
        return 64 << 20          # v7x-safe fallback


def _phase2_vmem_bytes(tm, tn, d, sm, rpad, x_bytes, cd_bytes, out_bytes):
    v = 2 * tm * d * x_bytes            # x tile (double buffered)
    v += 2 * tm * tn * out_bytes        # out tile (double buffered)
    v += 1 * d * sm * cd_bytes          # fused "small" weight block (Buffered(1))
    v += 2 * d * tn * cd_bytes          # Worg n-tile
    v += 2 * 2 * rpad * tn * cd_bytes   # stacked up-projection n-tile
    v += 2 * tn * 4                     # borg n-tile (f32)
    v += tm * 2 * rpad * cd_bytes       # hs scratch
    # f32 intermediates (xs, acc) + in-kernel cast of x: headroom
    v += tm * sm * 4 + 2 * tm * tn * 4 + tm * d * cd_bytes
    return v


def _select_tiles(m, d, wcols, rpad, sm, x_bytes, cd_bytes, out_bytes,
                  block_m=None, block_n=None):
    """Generation/VMEM-aware tile selection + explicit vmem limit."""
    cap = _vmem_capacity_bytes()
    budget = int(cap * 0.7)

    if block_n is not None:
        assert block_n % 128 == 0 and wcols % block_n == 0
        tn_cands = [block_n]
    else:
        tn_cands = [wcols] + [t for t in (2048, 1024, 512, 256, 128)
                              if t < wcols and wcols % t == 0]

    if block_m is not None:
        assert m % block_m == 0
        tm_cands = [block_m]
    else:
        tm_cands = [t for t in (1024, 512, 256, 128, 64, 32, 16, 8)
                    if t <= m and m % t == 0]
        if not tm_cands:
            tm_cands = [m]       # awkward m: single full-dim tile (small-m only)

    tm, tn = tm_cands[-1], tn_cands[-1]
    found = False
    for tm_c in tm_cands:                 # prefer the largest m tile ...
        for tn_c in tn_cands:             # ... then the largest n tile that fits
            if _phase2_vmem_bytes(tm_c, tn_c, d, sm, rpad,
                                  x_bytes, cd_bytes, out_bytes) <= budget:
                tm, tn, found = tm_c, tn_c, True
                break
        if found:
            break

    need = _phase2_vmem_bytes(tm, tn, d, sm, rpad, x_bytes, cd_bytes, out_bytes)
    vmem_limit = int(min(cap, max(need + (8 << 20), 32 << 20)))
    return tm, tn, vmem_limit


# ---------------------------------------------------------------------------
# Fused main kernel: routing + experts + main branch, tiled over (B, m, d2).
# ---------------------------------------------------------------------------
def _moe_kernel(rpad, gate_ref, bphi_ref, x_ref, wsm_ref, worg_ref, wup_ref,
                borg_ref, o_ref, hs_ref):
    b = pl.program_id(0)
    n = pl.program_id(2)

    # cast x on the VPU inside the kernel (no pre-materialized bf16 copy in HBM)
    xc = x_ref[...].astype(wsm_ref.dtype)                     # (tm, d)

    @pl.when(n == 0)
    def _():
        # fused skinny pass: [x@Wd0 | pad | x@Wd1 | pad | x@Wphi | 0] (one
        # 128-lane MXU column group), computed once per (b, m-tile).
        xs = jnp.dot(xc, wsm_ref[...], preferred_element_type=jnp.float32)
        h01 = xs[:, 0:2 * rpad]                                # (tm, 2*rpad)
        l0 = xs[:, 2 * rpad:2 * rpad + 1] + bphi_ref[0]        # (tm, 1)
        l1 = xs[:, 2 * rpad + 1:2 * rpad + 2] + bphi_ref[1]
        w0 = jax.nn.sigmoid(l0) * gate_ref[b, 0]               # D[:,0] * g0
        w1 = jax.nn.sigmoid(l1) * gate_ref[b, 1]               # D[:,1] * g1
        col = lax.broadcasted_iota(jnp.int32, h01.shape, 1)
        tokw = jnp.where(col < rpad, w0, w1)
        hs_ref[...] = (h01 * tokw).astype(hs_ref.dtype)        # persisted over n

    # main branch n-tile + MoE residual, accumulated in f32
    acc = jnp.dot(xc, worg_ref[...], preferred_element_type=jnp.float32)
    acc += jnp.dot(hs_ref[...], wup_ref[...], preferred_element_type=jnp.float32)
    acc += borg_ref[...]
    o_ref[...] = acc.astype(o_ref.dtype)


# ---------------------------------------------------------------------------
# Weight packing (once per weight update, NOT per forward call).
# ---------------------------------------------------------------------------
def pack_moe_weights(params, *, compute_dtype=jnp.bfloat16):
    f32 = jnp.float32
    cd = compute_dtype
    d2, rank = params["w_u0"].shape
    d = params["w_d0"].shape[1]
    assert params["w_phi"].shape[0] == 2, "exactly two experts (face, hand)"

    rpad = _round_up(rank, 8)                 # per-expert rank pad -> K dim = 16k
    sm = _round_up(2 * rpad + 2, 128)         # width of the fused small column group
    wcols = _round_up(d2, 128)                # padded weight width (output stays d2)

    wd0_t = params["w_d0"].T.astype(f32)      # (d, r)
    wd1_t = params["w_d1"].T.astype(f32)
    wphi_t = params["w_phi"].T.astype(f32)    # (d, 2)
    wu0s = params["w_u0"].T.astype(f32) * params["scale0"]   # (r, d2), scale folded
    wu1s = params["w_u1"].T.astype(f32) * params["scale1"]

    # fused skinny RHS: [Wd0 | 0 | Wd1 | 0 | Wphi | 0]   (d, sm)
    wsm = jnp.zeros((d, sm), f32)
    wsm = wsm.at[:, 0:rank].set(wd0_t)
    wsm = wsm.at[:, rpad:rpad + rank].set(wd1_t)
    wsm = wsm.at[:, 2 * rpad:2 * rpad + 2].set(wphi_t)

    # stacked, scale-folded up projection, zero rows on the rank padding
    wup = jnp.zeros((2 * rpad, wcols), f32)
    wup = wup.at[0:rank, 0:d2].set(wu0s)
    wup = wup.at[rpad:rpad + rank, 0:d2].set(wu1s)

    worg = jnp.zeros((d, wcols), f32).at[:, 0:d2].set(params["w_org"].T.astype(f32))
    borg = jnp.zeros((1, wcols), f32).at[0, 0:d2].set(params["b_org"].astype(f32))

    # gate folding: g_k = sigmoid( mean_m(x) . u_k + b_k )
    u0 = wd0_t @ (wu0s @ params["w_fs"].reshape(d2).astype(f32))          # (d,)
    u1 = wd1_t @ (wu1s @ params["w_hs"].reshape(d2).astype(f32))
    u = jnp.stack([u0, u1], axis=0)                                       # (2, d)
    bg = jnp.stack([params["b_fs"].reshape(()),
                    params["b_hs"].reshape(())]).astype(f32)              # (2,)

    return {
        "wsm": wsm.astype(cd),
        "wup": wup.astype(cd),
        "worg": worg.astype(cd),
        "borg": borg,                                   # f32
        "bphi": params["b_phi"].astype(f32),            # (2,)
        "u": u,
        "bg": bg,
        "meta": dict(d=d, d2=d2, rank=rank, rpad=rpad, sm=sm, wcols=wcols,
                     compute_dtype=cd),
    }


# ---------------------------------------------------------------------------
# Forward wrapper
# ---------------------------------------------------------------------------
def wrapper_moe_forward(x, packed, *, block_m=None, block_n=None):
    """x: (B, m, d).  Returns (B, m, d2) in x.dtype."""
    meta = packed["meta"]
    d, d2 = meta["d"], meta["d2"]
    rpad, sm, wcols = meta["rpad"], meta["sm"], meta["wcols"]
    cd = meta["compute_dtype"]
    B, m, dx = x.shape
    assert dx == d

    # global per-batch gates: pure bandwidth reduction + (B,d)@(d,2) -> plain XLA
    xmean = jnp.mean(x.astype(jnp.float32), axis=1)                   # (B, d)
    gates = jax.nn.sigmoid(xmean @ packed["u"].T + packed["bg"])      # (B, 2)

    tm, tn, vmem_limit = _select_tiles(
        m, d, wcols, rpad, sm,
        jnp.dtype(x.dtype).itemsize, jnp.dtype(cd).itemsize,
        jnp.dtype(x.dtype).itemsize,
        block_m=block_m, block_n=block_n)
    assert m % tm == 0, "m must be divisible by the m tile"
    n_mt = m // tm
    n_nt = wcols // tn

    inv = pl.Buffered(1)                                  # grid-invariant weights
    wmode = pl.Buffered(1) if n_nt == 1 else pl.Buffered(2)

    kernel = functools.partial(_moe_kernel, rpad)
    out = pl.pallas_call(
        kernel,
        out_shape=jax.ShapeDtypeStruct((B, m, d2), x.dtype),
        grid=(B, n_mt, n_nt),
        in_specs=[
            pl.BlockSpec(memory_space=pltpu.MemorySpace.SMEM),            # gates (B,2)
            pl.BlockSpec(memory_space=pltpu.MemorySpace.SMEM),            # bphi (2,)
            pl.BlockSpec((None, tm, d), lambda b, t, n: (b, t, 0)),       # x tile
            pl.BlockSpec((d, sm), lambda b, t, n: (0, 0),
                         pipeline_mode=inv),                              # fused small RHS
            pl.BlockSpec((d, tn), lambda b, t, n: (0, n),
                         pipeline_mode=wmode),                            # Worg n-tile
            pl.BlockSpec((2 * rpad, tn), lambda b, t, n: (0, n),
                         pipeline_mode=wmode),                            # up-proj n-tile
            pl.BlockSpec((1, tn), lambda b, t, n: (0, n),
                         pipeline_mode=wmode),                            # borg n-tile
        ],
        out_specs=pl.BlockSpec((None, tm, tn), lambda b, t, n: (b, t, n)),
        scratch_shapes=[pltpu.VMEM((tm, 2 * rpad), cd)],                  # hs scratch
        compiler_params=pltpu.CompilerParams(
            dimension_semantics=("parallel", "parallel", "arbitrary"),
            vmem_limit_bytes=vmem_limit),
    )(gates, packed["bphi"], x, packed["wsm"], packed["worg"],
      packed["wup"], packed["borg"])
    return out


# ---------------------------------------------------------------------------
# Plain-JAX reference (replica of WrapperMoELayer.forward, Linear / 3D path)
# ---------------------------------------------------------------------------
def reference(x, p):
    logits = jnp.einsum("bmd,nd->bmn", x, p["w_phi"]) + p["b_phi"]
    D = jax.nn.sigmoid(logits)
    r0 = jnp.einsum("bmr,or->bmo",
                    jnp.einsum("bmd,rd->bmr", x, p["w_d0"]), p["w_u0"]) * p["scale0"]
    r1 = jnp.einsum("bmr,or->bmo",
                    jnp.einsum("bmd,rd->bmr", x, p["w_d1"]), p["w_u1"]) * p["scale1"]
    g0 = jax.nn.sigmoid(jnp.einsum("bo,o->b", r0.mean(axis=1), p["w_fs"][0])
                        + p["b_fs"][0])[:, None, None]
    g1 = jax.nn.sigmoid(jnp.einsum("bo,o->b", r1.mean(axis=1), p["w_hs"][0])
                        + p["b_hs"][0])[:, None, None]
    y = r0 * D[..., 0:1] * g0 + r1 * D[..., 1:2] * g1
    main = jnp.einsum("bmd,od->bmo", x, p["w_org"]) + p["b_org"]
    return main + y


def make_params(key, d, d2, rank, n=2):
    ks = jax.random.split(key, 12)
    s = 0.1
    return {
        "w_phi": s * jax.random.normal(ks[0], (n, d), jnp.float32),
        "b_phi": s * jax.random.normal(ks[1], (n,), jnp.float32),
        "w_d0": s * jax.random.normal(ks[2], (rank, d), jnp.float32),
        "w_u0": s * jax.random.normal(ks[3], (d2, rank), jnp.float32),
        "w_d1": s * jax.random.normal(ks[4], (rank, d), jnp.float32),
        "w_u1": s * jax.random.normal(ks[5], (d2, rank), jnp.float32),
        "w_fs": s * jax.random.normal(ks[6], (1, d2), jnp.float32),
        "b_fs": s * jax.random.normal(ks[7], (1,), jnp.float32),
        "w_hs": s * jax.random.normal(ks[8], (1, d2), jnp.float32),
        "b_hs": s * jax.random.normal(ks[9], (1,), jnp.float32),
        "w_org": s * jax.random.normal(ks[10], (d2, d), jnp.float32),
        "b_org": s * jax.random.normal(ks[11], (d2,), jnp.float32),
        "scale0": 1.0,   # expert.scale = alpha / rank  (face)
        "scale1": 0.5,   # expert.scale = alpha / rank  (hand)
    }


if __name__ == "__main__":
    key = jax.random.PRNGKey(0)
    k1, k2, k3, k4 = jax.random.split(key, 4)

    # ---- config 1: single n tile, explicit m tiling + auto tiles -----------
    B, m, d, d2, rank = 2, 16, 32, 48, 4
    x = jax.random.normal(k1, (B, m, d), jnp.float32)
    params = make_params(k2, d, d2, rank)
    ref = jax.block_until_ready(reference(x, params))

    packed32 = pack_moe_weights(params, compute_dtype=jnp.float32)   # exact path
    out32 = jax.block_until_ready(wrapper_moe_forward(x, packed32, block_m=8))
    assert out32.shape == (B, m, d2)
    err32 = float(jnp.max(jnp.abs(out32 - ref)))
    assert jnp.allclose(out32, ref, atol=2e-3, rtol=2e-3), err32

    packedbf = pack_moe_weights(params, compute_dtype=jnp.bfloat16)  # fast path
    outbf = jax.block_until_ready(wrapper_moe_forward(x, packedbf))
    assert outbf.shape == (B, m, d2)
    errbf = float(jnp.max(jnp.abs(outbf.astype(jnp.float32) - ref)))
    assert jnp.allclose(outbf.astype(jnp.float32), ref, atol=6e-2, rtol=6e-2), errbf

    # ---- config 2: m tiling + d2 (n) tiling + ragged last output block -----
    B2, m2, d_2, d2_2, rank2 = 2, 24, 32, 200, 4
    x2 = jax.random.normal(k3, (B2, m2, d_2), jnp.float32)
    params2 = make_params(k4, d_2, d2_2, rank2)
    ref2 = jax.block_until_ready(reference(x2, params2))
    packed2 = pack_moe_weights(params2, compute_dtype=jnp.float32)
    out2 = jax.block_until_ready(
        wrapper_moe_forward(x2, packed2, block_m=8, block_n=128))
    assert out2.shape == (B2, m2, d2_2)
    err2 = float(jnp.max(jnp.abs(out2 - ref2)))
    assert jnp.allclose(out2, ref2, atol=2e-3, rtol=2e-3), err2

    print("KERNEL_OK")
</pallas_src>

<mosaic_0001>
module attributes {stable_mosaic.version = 11 : i64} {
  func.func @_moe_kernel(%arg0: i32, %arg1: i32, %arg2: i32, %arg3: memref<2x2xf32, #tpu.memory_space<smem>>, %arg4: memref<2xf32, #tpu.memory_space<smem>>, %arg5: memref<1x8x32xf32, #tpu.memory_space<vmem>>, %arg6: memref<32x128xf32, #tpu.memory_space<vmem>>, %arg7: memref<32x128xf32, #tpu.memory_space<vmem>>, %arg8: memref<16x128xf32, #tpu.memory_space<vmem>>, %arg9: memref<1x128xf32, #tpu.memory_space<vmem>>, %arg10: memref<1x8x128xf32, #tpu.memory_space<vmem>>, %arg11: memref<8x16xf32, #tpu.memory_space<vmem>>) attributes {dimension_semantics = [#tpu.dimension_semantics<parallel>, #tpu.dimension_semantics<parallel>, #tpu.dimension_semantics<arbitrary>], iteration_bounds = array<i64: 2, 2, 1>, scalar_prefetch = 0 : i64, scratch_operands = 1 : i64, tpu.core_type = #tpu.core_type<tc>, window_params = [{transform_indices = @transform_0, window_bounds = array<i64: 2, 2>}, {transform_indices = @transform_1, window_bounds = array<i64: 2>}, {transform_indices = @transform_2, window_bounds = array<i64: 1, 8, 32>}, {pipeline_mode = #tpu.pipeline_mode<synchronous>, transform_indices = @transform_3, window_bounds = array<i64: 32, 128>}, {pipeline_mode = #tpu.pipeline_mode<synchronous>, transform_indices = @transform_4, window_bounds = array<i64: 32, 128>}, {pipeline_mode = #tpu.pipeline_mode<synchronous>, transform_indices = @transform_5, window_bounds = array<i64: 16, 128>}, {pipeline_mode = #tpu.pipeline_mode<synchronous>, transform_indices = @transform_6, window_bounds = array<i64: 1, 128>}, {transform_indices = @transform_7, window_bounds = array<i64: 1, 8, 128>}]} {
    %c0 = arith.constant 0 : index
    %c0_0 = arith.constant 0 : index
    %c0_1 = arith.constant 0 : index
    %0 = vector.load %arg5[%c0, %c0_0, %c0_1] : memref<1x8x32xf32, #tpu.memory_space<vmem>>, vector<1x8x32xf32>
    %1 = vector.shape_cast %0 : vector<1x8x32xf32> to vector<8x32xf32>
    %c0_i32 = arith.constant 0 : i32
    %2 = arith.cmpi eq, %arg2, %c0_i32 : i32
    %3 = arith.extui %2 : i1 to i32
    %c0_i32_2 = arith.constant 0 : i32
    %4 = arith.cmpi ne, %3, %c0_i32_2 : i32
    scf.if %4 {
      %c0_15 = arith.constant 0 : index
      %c0_16 = arith.constant 0 : index
      %17 = vector.load %arg6[%c0_15, %c0_16] : memref<32x128xf32, #tpu.memory_space<vmem>>, vector<32x128xf32>
      %cst_17 = arith.constant dense<0.000000e+00> : vector<8x128xf32>
      %18 = tpu.matmul %1, %17, %cst_17 {dimension_numbers = #tpu.dot_dimension_numbers<[1], [0], [0], [1], [0, 0, 1, 1], [], []>} : vector<8x32xf32>, vector<32x128xf32>, vector<8x128xf32> -> vector<8x128xf32>
      %19 = vector.extract_strided_slice %18 {offsets = [0, 0], sizes = [8, 16], strides = [1, 1]} : vector<8x128xf32> to vector<8x16xf32>
      %20 = vector.extract_strided_slice %18 {offsets = [0, 16], sizes = [8, 1], strides = [1, 1]} : vector<8x128xf32> to vector<8x1xf32>
      %c0_18 = arith.constant 0 : index
      %21 = memref.load %arg4[%c0_18] : memref<2xf32, #tpu.memory_space<smem>>
      %22 = vector.broadcast %21 : f32 to vector<8x1xf32>
      %23 = arith.addf %20, %22 : vector<8x1xf32>
      %24 = vector.extract_strided_slice %18 {offsets = [0, 17], sizes = [8, 1], strides = [1, 1]} : vector<8x128xf32> to vector<8x1xf32>
      %c1 = arith.constant 1 : index
      %25 = memref.load %arg4[%c1] : memref<2xf32, #tpu.memory_space<smem>>
      %26 = vector.broadcast %25 : f32 to vector<8x1xf32>
      %27 = arith.addf %24, %26 : vector<8x1xf32>
      %28 = arith.negf %23 : vector<8x1xf32>
      %29 = math.exp %28 : vector<8x1xf32>
      %cst_19 = arith.constant 1.000000e+00 : f32
      %30 = vector.broadcast %cst_19 : f32 to vector<8x1xf32>
      %31 = arith.addf %30, %29 : vector<8x1xf32>
      %32 = arith.divf %30, %31 : vector<8x1xf32>
      %33 = arith.index_cast %arg0 : i32 to index
      %c0_20 = arith.constant 0 : index
      %34 = memref.load %arg3[%33, %c0_20] : memref<2x2xf32, #tpu.memory_space<smem>>
      %35 = vector.broadcast %34 : f32 to vector<8x1xf32>
      %36 = arith.mulf %32, %35 : vector<8x1xf32>
      %37 = arith.negf %27 : vector<8x1xf32>
      %38 = math.exp %37 : vector<8x1xf32>
      %cst_21 = arith.constant 1.000000e+00 : f32
      %39 = vector.broadcast %cst_21 : f32 to vector<8x1xf32>
      %40 = arith.addf %39, %38 : vector<8x1xf32>
      %41 = arith.divf %39, %40 : vector<8x1xf32>
      %42 = arith.index_cast %arg0 : i32 to index
      %c1_22 = arith.constant 1 : index
      %43 = memref.load %arg3[%42, %c1_22] : memref<2x2xf32, #tpu.memory_space<smem>>
      %44 = vector.broadcast %43 : f32 to vector<8x1xf32>
      %45 = arith.mulf %41, %44 : vector<8x1xf32>
      %46 = tpu.iota {dimensions = array<i32: 1>} : vector<8x16xi32>
      %c8_i32 = arith.constant 8 : i32
      %47 = vector.broadcast %c8_i32 : i32 to vector<8x16xi32>
      %48 = arith.cmpi slt, %46, %47 : vector<8x16xi32>
      %49 = vector.shape_cast %36 : vector<8x1xf32> to vector<8x1xf32>
      %50 = vector.broadcast %49 : vector<8x1xf32> to vector<8x16xf32>
      %51 = vector.shape_cast %45 : vector<8x1xf32> to vector<8x1xf32>
      %52 = vector.broadcast %51 : vector<8x1xf32> to vector<8x16xf32>
      %53 = arith.select %48, %50, %52 : vector<8x16xi1>, vector<8x16xf32>
      %54 = arith.mulf %19, %53 : vector<8x16xf32>
      %c0_23 = arith.constant 0 : index
      %c0_24 = arith.constant 0 : index
      %55 = vector.load %arg11[%c0_23, %c0_24] : memref<8x16xf32, #tpu.memory_space<vmem>>, vector<8x16xf32>
      tpu.vector_store %arg11[%c0_23, %c0_24], %54 {strides = array<i32>} : memref<8x16xf32, #tpu.memory_space<vmem>>, vector<8x16xf32>,
    } else {
    }
    %c0_3 = arith.constant 0 : index
    %c0_4 = arith.constant 0 : index
    %5 = vector.load %arg7[%c0_3, %c0_4] : memref<32x128xf32, #tpu.memory_space<vmem>>, vector<32x128xf32>
    %cst = arith.constant dense<0.000000e+00> : vector<8x128xf32>
    %6 = tpu.matmul %1, %5, %cst {dimension_numbers = #tpu.dot_dimension_numbers<[1], [0], [0], [1], [0, 0, 1, 1], [], []>} : vector<8x32xf32>, vector<32x128xf32>, vector<8x128xf32> -> vector<8x128xf32>
    %c0_5 = arith.constant 0 : index
    %c0_6 = arith.constant 0 : index
    %7 = vector.load %arg11[%c0_5, %c0_6] : memref<8x16xf32, #tpu.memory_space<vmem>>, vector<8x16xf32>
    %c0_7 = arith.constant 0 : index
    %c0_8 = arith.constant 0 : index
    %8 = vector.load %arg8[%c0_7, %c0_8] : memref<16x128xf32, #tpu.memory_space<vmem>>, vector<16x128xf32>
    %cst_9 = arith.constant dense<0.000000e+00> : vector<8x128xf32>
    %9 = tpu.matmul %7, %8, %cst_9 {dimension_numbers = #tpu.dot_dimension_numbers<[1], [0], [0], [1], [0, 0, 1, 1], [], []>} : vector<8x16xf32>, vector<16x128xf32>, vector<8x128xf32> -> vector<8x128xf32>
    %10 = arith.addf %6, %9 : vector<8x128xf32>
    %c0_10 = arith.constant 0 : index
    %c0_11 = arith.constant 0 : index
    %11 = vector.load %arg9[%c0_10, %c0_11] : memref<1x128xf32, #tpu.memory_space<vmem>>, vector<1x128xf32>
    %12 = vector.broadcast %11 : vector<1x128xf32> to vector<8x128xf32>
    %13 = arith.addf %10, %12 : vector<8x128xf32>
    %c0_12 = arith.constant 0 : index
    %c0_13 = arith.constant 0 : index
    %c0_14 = arith.constant 0 : index
    %14 = vector.load %arg10[%c0_12, %c0_13, %c0_14] : memref<1x8x128xf32, #tpu.memory_space<vmem>>, vector<1x8x128xf32>
    %15 = vector.shape_cast %14 : vector<1x8x128xf32> to vector<8x128xf32>
    %16 = vector.shape_cast %13 : vector<8x128xf32> to vector<1x8x128xf32>
    tpu.vector_store %arg10[%c0_12, %c0_13, %c0_14], %16 {strides = array<i32>} : memref<1x8x128xf32, #tpu.memory_space<vmem>>, vector<1x8x128xf32>,
    return
  }
  func.func @transform_0(%arg0: i32, %arg1: i32, %arg2: i32) -> (i32, i32) {
    %c0_i32 = arith.constant 0 : i32
    %c0_i32_0 = arith.constant 0 : i32
    %c0_i32_1 = arith.constant 0 : i32
    return %c0_i32, %c0_i32_0 : i32, i32
  }
  func.func @transform_1(%arg0: i32, %arg1: i32, %arg2: i32) -> i32 {
    %c0_i32 = arith.constant 0 : i32
    %c0_i32_0 = arith.constant 0 : i32
    return %c0_i32 : i32
  }
  func.func @transform_2(%arg0: i32, %arg1: i32, %arg2: i32) -> (i32, i32, i32) {
    %c0_i32 = arith.constant 0 : i32
    %c0_i32_0 = arith.constant 0 : i32
    return %arg0, %arg1, %c0_i32 : i32, i32, i32
  }
  func.func @transform_3(%arg0: i32, %arg1: i32, %arg2: i32) -> (i32, i32) {
    %c0_i32 = arith.constant 0 : i32
    %c0_i32_0 = arith.constant 0 : i32
    %c0_i32_1 = arith.constant 0 : i32
    return %c0_i32, %c0_i32_0 : i32, i32
  }
  func.func @transform_4(%arg0: i32, %arg1: i32, %arg2: i32) -> (i32, i32) {
    %c0_i32 = arith.constant 0 : i32
    %c0_i32_0 = arith.constant 0 : i32
    return %c0_i32, %arg2 : i32, i32
  }
  func.func @transform_5(%arg0: i32, %arg1: i32, %arg2: i32) -> (i32, i32) {
    %c0_i32 = arith.constant 0 : i32
    %c0_i32_0 = arith.constant 0 : i32
    return %c0_i32, %arg2 : i32, i32
  }
  func.func @transform_6(%arg0: i32, %arg1: i32, %arg2: i32) -> (i32, i32) {
    %c0_i32 = arith.constant 0 : i32
    %c0_i32_0 = arith.constant 0 : i32
    return %c0_i32, %arg2 : i32, i32
  }
  func.func @transform_7(%arg0: i32, %arg1: i32, %arg2: i32) -> (i32, i32, i32) {
    %c0_i32 = arith.constant 0 : i32
    return %arg0, %arg1, %arg2 : i32, i32, i32
  }
}

</mosaic_0001>

<bundles_post_ra>
// kernel: tpu_custom_call.1
= control target key start
LH: loop header
LB: loop body
LE: loop exit
PB: predicated region body
PF: predicated region fallthrough
CT: control target
= control target key end

     0   :  { %s1721_s0 = inlined_call_operand.hbm [shape: f32[2,2], index: 0, kind: input, shape index: {}]   ;;  %s1722_s1 = inlined_call_operand.vmem [shape: f32[2], index: 1, kind: input, shape index: {}]   ;;  %s1723_s2 = inlined_call_operand.hbm [shape: f32[2,16,32], index: 2, kind: input, shape index: {}]   ;;  %s1724_s3 = inlined_call_operand.hbm [shape: f32[32,128], index: 3, kind: input, shape index: {}]   ;;  %s1725_s4 = inlined_call_operand.hbm [shape: f32[32,128], index: 4, kind: input, shape index: {}]   ;;  %s1726_s5 = inlined_call_operand.vmem [shape: f32[16,128], index: 5, kind: input, shape index: {}]   ;;  %s1727_s6 = inlined_call_operand.vmem [shape: f32[1,128], index: 6, kind: input, shape index: {}]   ;;  %s1728_s7 = inlined_call_operand.hbm [shape: f32[2,16,48], index: 7, kind: output, shape index: {}]  }
   0x1   :  { %1735 = sst [smem:[#allocation19_spill]] %s1721_s0 }
   0x2   :  { %1736 = sst [smem:[#allocation20_spill]] %s1722_s1 }
   0x3   :  { %1737 = sst [smem:[#allocation21_spill]] %s1724_s3 }
   0x4   :  { %1738 = sst [smem:[#allocation22_spill]] %s1725_s4 }
   0x5   :  { %1739 = sst [smem:[#allocation23_spill]] %s1727_s6 }
   0x6   :  { %1740 = sst [smem:[#allocation24_spill]] %s1728_s7 }
   0x7   :  { %12 = vsyncpa [#allocation6], 0 }
   0x8   :  { %13 = vsyncpa [#allocation7], 0 }
   0x9   :  { %14 = vsyncpa [#allocation4], 0 }
   0xa   :  { %16 = vsyncpa [#allocation4 + $0x1], 0 }
   0xb   :  { %17 = vsyncpa [#allocation11], 0 }
   0xc   :  { %18 = vsyncpa [#allocation5], 0 }
   0xd   :  { %20 = vsyncpa [#allocation5 + $0x1], 0  ;;  %s1386_s24 = smov 0   ;;  %s1388_s25 = smov 0  }
   0xe   :  { %s1390_s26 = smov 0   ;;  %s1392_s27 = smov 0  }
   0xf   :  { %s1394_s28 = smov 0   ;;  %s1396_s29 = smov 0  }
  0x10   :  { %s1398_s30 = smov 0   ;;  %s1400_s8 = smov 0  }
  0x11 LB: > { %s1333_s9 = smov [#allocation10]   ;;  %s1732_s11 = sadd.s32 4294967295, %s1331_s8   ;;  %s1331_s8 = sphi %s1400_s8, %s26_s8   ;;  %s1327_s30 = sphi %s1398_s30, %s1768_s30   ;;  %s1323_s29 = sphi %s1396_s29, %s1767_s29   ;;  %s1319_s28 = sphi %s1394_s28, %s1766_s28   ;;  %s1315_s27 = sphi %s1392_s27, %s1765_s27   ;;  %s1311_s26 = sphi %s1390_s26, %s1764_s26   ;;  %s1307_s25 = sphi %s1388_s25, %s1763_s25   ;;  %s1303_s24 = sphi %s1386_s24, %s1762_s24  }
  0x12   : > { %s281_s10 = sshll.u32 %s1333_s9, 4  ;;  %p883_p0 = scmp.ge.s32.totalorder %s1331_s8, 1  ;;  %s282_s10 = int_to_ptr.vmem [resolvable:$true] %s281_s10 }
  0x13   : > { %p1430_p1 = scmp.eq.s32.totalorder %s1732_s11, 0  ;;  %p249_p2 = scmp.lt.s32.totalorder %s1331_s8, 5 }
  0x14   : > { %s1744_s1 = sld [smem:[#allocation20_spill]]  ;;  %s1745_s3 = sld [smem:[#allocation21_spill]] }
  0x15   : > { %s1741_s12 = scalar_select %p1430_p1, 1, 0 }
  0x16   : > { %p1435_p3 = pnand %p883_p0, %p249_p2 }
  0x18   : > { %s1742_s13 = scalar_select %p1435_p3, 1, 0 }
  0x19   : > { %p991_p4 = pneg %p1435_p3 }
  0x1a   : > { %s271_s17 = sshll.u32 %s1744_s1, 4  ;;  %s1107_s20 = scalar_lea.hbm %s1745_s3, 512  ;;  %s1450_s17 = int_to_ptr.vmem [resolvable:$true] %s271_s17 }
  0x1b   : > { %p1443_p5 = pnand %p991_p4, %p1430_p1  ;;  %p1108_p6 = scmp.ne.s32.totalorder %s1745_s3, %s1107_s20 }
  0x1c   : > { %p1114_p10 = scmp.lt.u32.totalorder %s1107_s20, %s1745_s3 }
  0x1d   : > { %p1460_p7 = pneg %p1443_p5 }
  0x1f   : > { %p1110_p8 = pnand %p1460_p7, %p1108_p6 }
  0x21   : > { %p1111_p9 = pneg %p1110_p8 }
  0x23   : > { %p1116_p11 = pnand %p1114_p10, %p1111_p9 }
  0x25   : > { %1119 = shalt.err (!%p1116_p11)
}
  0x26   : > { %s1120_s16 = scalar_lea.vmem %s282_s10, 512  ;;  %p1128_p2 = scmp.lt.s32.totalorder %s282_s10, %s282_s10 }
  0x27   : > { %p1121_p12 = scmp.ne.s32.totalorder %s282_s10, %s1120_s16  ;;  %p1129_p4 = scmp.lt.s32.totalorder %s1120_s16, %s1120_s16 }
  0x29   : > { %p1123_p13 = pnand %p1121_p12, %p1460_p7  ;;  %p1130_p3 = por %p1129_p4, %p1128_p2 }
  0x2b   : > { %p1124_p0 = pneg %p1123_p13 }
  0x2d   : > { %p1131_p1 = pnand %p1130_p3, %p1124_p0 }
  0x2f   : > { %1134 = shalt.err (!%p1131_p1)
}
  0x30   : > { %s1334_s18 = smov 128   ;;  %s1335_s19 = smov 8  }
  0x31   : > { %1000 = dma.hbm_to_vmem [thread:$0]  (!%p1443_p5), %s1745_s3, 512, %s282_s10, [#allocation11], %s1334_s18, %s1334_s18, %s1335_s19  }
  0x32   : > { %s1747_s0 = sld [smem:[#allocation19_spill]] }
  0x38   : > { %s1135_s15 = scalar_lea.hbm %s1747_s0, 32 }
  0x39   : > { %p1136_p1 = scmp.ne.s32.totalorder %s1747_s0, %s1135_s15  ;;  %p1142_p8 = scmp.lt.u32.totalorder %s1135_s15, %s1747_s0 }
  0x3b   : > { %p1138_p3 = pnand %p1136_p1, %p1460_p7 }
  0x3d   : > { %p1139_p6 = pneg %p1138_p3 }
  0x3f   : > { %p1144_p9 = pnand %p1142_p8, %p1139_p6 }
  0x41   : > { %1147 = shalt.err (!%p1144_p9)
}
  0x42   : > { %s1336_s6 = smov [#allocation3]   ;;  %s1148_s11 = scalar_lea.vmem %s1450_s17, 16 }
  0x43   : > { %994 = dma.hbm_to_smem (!%p1443_p5), %s1747_s0, 32, %s1336_s6, [#allocation6]  }
  0x44   : > { %p1149_p10 = scmp.ne.s32.totalorder %s1450_s17, %s1148_s11  ;;  %p1156_p13 = scmp.lt.s32.totalorder %s1450_s17, %s1450_s17 }
  0x45   : > { %p1157_p0 = scmp.lt.s32.totalorder %s1148_s11, %s1148_s11 }
  0x46   : > { %p1151_p11 = pnand %p1149_p10, %p1460_p7 }
  0x47   : > { %p1158_p2 = por %p1157_p0, %p1156_p13 }
  0x48   : > { %p1152_p12 = pneg %p1151_p11 }
  0x4a   : > { %p1159_p4 = pnand %p1158_p2, %p1152_p12 }
  0x4c   : > { %1162 = shalt.err (!%p1159_p4)
}
  0x4d   : > { %s1337_s1 = smov [#allocation8]   ;;  %s1338_s7 = smov [#allocation12]  }
  0x4e   : > { %997 = dma.vmem_to_smem (!%p1443_p5), %s1450_s17, 16, %s1337_s1, [#allocation7]  }
  0x4f   : > { %s296_s21 = sshll.u32 %s1338_s7, 4  ;;  %s1748_s4 = sld [smem:[#allocation22_spill]]  ;;  %s297_s21 = int_to_ptr.vmem [resolvable:$true] %s296_s21 }
  0x55   : > { %s1163_s9 = scalar_lea.hbm %s1748_s4, 512 }
  0x56   : > { %p1164_p1 = scmp.ne.s32.totalorder %s1748_s4, %s1163_s9  ;;  %p1170_p8 = scmp.lt.u32.totalorder %s1163_s9, %s1748_s4 }
  0x58   : > { %p1166_p3 = pnand %p1164_p1, %p1460_p7 }
  0x5a   : > { %p1167_p6 = pneg %p1166_p3 }
  0x5c   : > { %p1172_p9 = pnand %p1170_p8, %p1167_p6 }
  0x5e   : > { %1175 = shalt.err (!%p1172_p9)
}
  0x5f   : > { %s1176_s17 = scalar_lea.vmem %s297_s21, 512  ;;  %p1184_p13 = scmp.lt.s32.totalorder %s297_s21, %s297_s21 }
  0x60   : > { %p1177_p10 = scmp.ne.s32.totalorder %s297_s21, %s1176_s17  ;;  %p1185_p0 = scmp.lt.s32.totalorder %s1176_s17, %s1176_s17 }
  0x62   : > { %p1179_p11 = pnand %p1177_p10, %p1460_p7  ;;  %p1186_p2 = por %p1185_p0, %p1184_p13 }
  0x64   : > { %p1180_p12 = pneg %p1179_p11 }
  0x66   : > { %p1187_p4 = pnand %p1186_p2, %p1180_p12 }
  0x68   : > { %1190 = shalt.err (!%p1187_p4)
}
  0x69   : > { %1003 = dma.hbm_to_vmem [thread:$0]  (!%p1443_p5), %s1748_s4, 512, %s297_s21, [#allocation11], %s1334_s18, %s1334_s18, %s1335_s19  }
  0x6a   : > { %s41_s14 = sadd.s32 1, %s1323_s29  ;;  %s45_s23 = sadd.s32 1, %s1327_s30 }
  0x6b   : > { %p43_p7 = scmp.ge.s32.totalorder %s41_s14, 2  ;;  %s882_s7 = sadd.s32 4294967294, %s1331_s8  }
  0x6c   : > { %s96_s6 = sadd.s32 1, %s1311_s26  ;;  %p103_p1 = scmp.ne.s32.totalorder %s1311_s26, %s1307_s25 }
  0x6d   : > { %s1770_s14 = smov (%p43_p7, %s41_s14), 0  ;;  %s1772_s23 = smov (!%p43_p7, %s45_s23), %s1327_s30 }
  0x6e   : > { %s92_s22 = ssub.s32 %s1323_s29, %s1770_s14  ;;  %p47_p3 = scmp.ge.s32.totalorder %s1772_s23, 2 }
  0x6f   : > { %p109_p6 = scmp.ne.s32.totalorder %s1307_s25, %s1303_s24  ;;  %p104_p8 = scmp.eq.s32.totalorder %s1331_s8, 0 }
  0x70   : > { %s1749_s18 = sadd.s32 4294967295, %s1331_s8   ;;  %s1774_s23 = smov (%p47_p3, %s1772_s23), 0 }
  0x71   : > { %p236_p5 = scmp.eq.s32.totalorder %s1749_s18, 3  ;;  %p1750_p9 = scmp.ne.s32.totalorder %s1741_s12, 0 }
  0x72   : > { %s91_s9 = ssub.s32 %s1327_s30, %s1774_s23  ;;  %p242_p12 = scmp.eq.s32.totalorder %s882_s7, 3 }
  0x73   : > { %p1545_p10 = por %p1750_p9, %p109_p6  ;;  %p1549_p11 = por %p236_p5, %p103_p1 }
  0x74   : > { %s93_s15 = sor.u32 %s92_s22, %s91_s9  ;;  %p1555_p13 = por %p104_p8, %p103_p1 }
  0x75   : > { %s1752_s21 = scalar_select %p1549_p11, 1, 0 }
  0x76   : > { %p94_p0 = scmp.eq.s32.totalorder %s93_s15, 0  ;;  %p1559_p2 = por %p242_p12, %p109_p6 }
  0x77   : > { %s323_s20 = sand.u32 1, %s1311_s26   ;;  %s892_s17 = sshll.u32 %s1327_s30, 1 }
  0x78   : > { %s1754_s10 = scalar_select %p1559_p2, 1, 0 }
  0x79   : > { %s1566_s11 = scalar_select %p94_p0, %s1311_s26, %s96_s6  }
  0x7a   : > { %p1016_p4 = scmp.lt.s32.totalorder %s1331_s8, 4  ;;  %s891_s1 = sshll.u32 %s323_s20, 3 }
  0x7b   : > { %s332_s18 = sadd.s32 %s1323_s29, %s892_s17  ;;  %s327_s7 = scalar_lea.vmem [#allocation9], %s891_s1 }
  0x7c   : > { %s893_s0 = sshll.u32 %s332_s18, 7  ;;  %s336_s22 = sshll.u32 %s327_s7, 4  ;;  %s1575_s22 = int_to_ptr.vmem [resolvable:$true] %s336_s22 }
  0x7d   : > { %s1573_s4 = scalar_lea.hbm %s1723_s2, %s893_s0  ;;  %p1579_p7 = pnand %p1016_p4, %p1555_p13 }
  0x7e   : > { %s324_s15 = scalar_lea.sflag [#allocation4], %s323_s20  ;;  %s1191_s17 = scalar_lea.hbm %s1573_s4, 128 }
  0x7f   : > { %p1192_p1 = scmp.ne.s32.totalorder %s1573_s4, %s1191_s17  ;;  %p1193_p3 = pneg %p1579_p7 }
  0x80   : > { %s1196_s1 = scalar_lea.hbm %s1723_s2, 512  ;;  %p1197_p5 = scmp.lt.u32.totalorder %s1573_s4, %s1723_s2 }
  0x81   : > { %p1194_p6 = pnand %p1193_p3, %p1192_p1  ;;  %p1198_p9 = scmp.lt.u32.totalorder %s1196_s1, %s1191_s17 }
  0x82   : > { %p1200_p13 = scmp.lt.u32.totalorder %s1191_s17, %s1573_s4 }
  0x83   : > { %p1195_p8 = pneg %p1194_p6  ;;  %p1199_p12 = por %p1198_p9, %p1197_p5 }
  0x85   : > { %p1201_p0 = por %p1200_p13, %p1199_p12 }
  0x87   : > { %p1202_p4 = pnand %p1201_p0, %p1195_p8 }
  0x89   : > { %1205 = shalt.err (!%p1202_p4)
}
  0x8a   : > { %s1206_s20 = scalar_lea.vmem %s1575_s22, 128  ;;  %s1339_s7 = smov [#allocation9]  }
  0x8b   : > { %p1207_p1 = scmp.ne.s32.totalorder %s1575_s22, %s1206_s20  ;;  %s1211_s9 = sshll.u32 %s1339_s7, 4  ;;  %s1212_s9 = int_to_ptr.vmem [resolvable:$false] %s1211_s9 }
  0x8c   : > { %s1213_s0 = scalar_lea.vmem %s1212_s9, 256  ;;  %p1214_p11 = scmp.lt.s32.totalorder %s1575_s22, %s1212_s9 }
  0x8d   : > { %p1209_p6 = pnand %p1207_p1, %p1193_p3  ;;  %p1215_p5 = scmp.lt.s32.totalorder %s1213_s0, %s1206_s20 }
  0x8f   : > { %p1210_p2 = pneg %p1209_p6  ;;  %p1216_p9 = por %p1215_p5, %p1214_p11 }
  0x91   : > { %p1217_p12 = pnand %p1216_p9, %p1210_p2 }
  0x93   : > { %1220 = shalt.err (!%p1217_p12)
}
  0x94   : > { %1007 = dma.hbm_to_vmem [thread:$0]  (!%p1579_p7), %s1573_s4, 128, %s1575_s22, %s324_s15  }
  0x95   : > { %p1756_p8 = scmp.ne.s32.totalorder %s1742_s13, 0 }
  0x96   : > { %p1757_p3 = scmp.ne.s32.totalorder (!%p1756_p8), %s1741_s12, 0 }
  0x97   : > { %345 = sbr.rel (%p1756_p8) target bundleno = 803 (0x323), region = 48 }
  0x9e   : > { %1282 = dma.done.wait (%p1757_p3), [#allocation6], 32  }
  0x9f   : > { %1284 = vsyncadd (%p1757_p3), [#allocation6], 4294967264 }
  0xa0   : > { %1286 = dma.done.wait (%p1757_p3), [#allocation7], 16  }
  0xa1   : > { %1288 = vsyncadd (%p1757_p3), [#allocation7], 4294967280  ;;  %s1619_s6 = sand.u32 1, %s1307_s25  }
  0xa2   : > { %s897_s4 = sshll.u32 %s1619_s6, 3  ;;  %s356_s13 = scalar_lea.sflag [#allocation4], %s1619_s6 }
  0xa3   : > { %s359_s22 = scalar_lea.vmem [#allocation9], %s897_s4 }
  0xa4   : > { %1290 = dma.done.wait (%p1545_p10), %s356_s13, 128  }
  0xa5   : > { %1292 = vsyncadd (%p1545_p10), %s356_s13, 4294967168 }
  0xa6   : > { %1294 = dma.done.wait (%p1757_p3), [#allocation11], 1024  }
  0xa7   : > { %1296 = vsyncadd (%p1757_p3), [#allocation11], 4294966272 }
  0xa8   : > { %372 = sfence }
  0xa9   : > { %v418_v0 = vld [vmem:[#allocation10] sm:$0xff]  ;;  %v419_v1 = vld [vmem:[#allocation10 + $0x8] sm:$0xff]  ;;  %v420_v2 = vld [vmem:[#allocation10 + $0x10] sm:$0xff]  ;;  %v1340_v3 = vmov 0.0|0.0   ;;  %vm1341_vm0 = vmmov 0   ;;  %v1342_v6 = vmov 0.0   ;;  %v522_v32 = vlaneseq }
  0xaa   : > { %956 = vmatprep.subr.bf16.mxu0 %v1340_v3  ;;  %v957_v4 = vpack.c.bf16 %v419_v1, %v418_v0  ;;  %v421_v5 = vld [vmem:[#allocation10 + $0x18] sm:$0xff]  ;;  %935 = vmatprep.mubr.msk.f32.mxu0 %vm1341_vm0, %v1342_v6  ;;  %vm422_vm1 = vcmask 261120   ;;  %v1343_v9 = vmov 16   ;;  %s496_s12 = sld [smem:[#allocation8]]  ;;  %s902_s19 = sld [smem:[#allocation8 + $0x1]]  ;;  %v1344_v28 = vmov 17  }
  0xab   : > { %962 = vmatprep.subr.bf16.mxu1 %v1340_v3  ;;  %942 = vmatprep.mubr.msk.f32.mxu1 %vm1341_vm0, %v1342_v6  ;;  %v960_v7 = vpack.c.bf16 %v421_v5, %v420_v2  ;;  %v1640_v8 = vld [vmem:[%s359_s22] sm:$0xff]  ;;  %s904_s15 = sshll.u32 %s1319_s28, 7  ;;  %v545_v30 = vld [vmem:[%s1726_s5 + $0x8] sm:$0xff]  ;;  %v523_v33 = vand.u32 127, %v522_v32  ;;  %vm537_vm3 = vcmask 130048   ;;  %v540_v39 = vld [vmem:[#allocation12 + $0x8] sm:$0xff] }
  0xac   : > { %958 = vmatpush3.bf16.msra.mxu0 %v957_v4  ;;  %1097 = vset.pattern.permute.xlu0 %v1343_v9  ;;  %s509_s17 = sld [smem:[#allocation3 + %s904_s15]]  ;;  %s518_s3 = sadd.s32 1, %s904_s15  ;;  %v544_v29 = vld [vmem:[%s1726_s5] sm:$0xff]  ;;  %v539_v38 = vld [vmem:[#allocation12] sm:$0xff]  ;;  %v541_v41 = vld [vmem:[#allocation12 + $0x10] sm:$0xff] }
  0xad   : > { %959 = vmatprep.subr.bf16.mxu0 %v1340_v3  ;;  %s519_s1 = sld [smem:[#allocation3 + %s518_s3]]  ;;  %v963_v31 = vpack.c.bf16 %v545_v30, %v544_v29  ;;  %vm524_vm2 = vcmp.lt.s32.totalorder %v523_v33, 8  ;;  %v966_v40 = vpack.c.bf16 %v540_v39, %v539_v38  ;;  %v542_v42 = vld [vmem:[#allocation12 + $0x18] sm:$0xff]  ;;  %s910_s9 = sshll.u32 %s1319_s28, 1 }
  0xae   : > { %v969_v44 = vpack.c.bf16 %v542_v42, %v541_v41  ;;  %s716_s0 = sadd.s32 %s1315_s27, %s910_s9  ;;  %s405_s15 = scalar_lea.vmem [#allocation13], %s897_s4 }
  0xaf   : > { %964 = vmatpush3.bf16.msra.mxu1 %v963_v31  ;;  %s1759_s16 = sld [smem:[#allocation24_spill]]  ;;  %s704_s27 = scalar_lea.sflag [#allocation5], %s1619_s6 }
  0xb0   : > { %961 = vmatpush3.bf16.msra.mxu0 %v960_v7  ;;  %v497_v10 = vstv %s496_s12  ;;  %v500_v11 = vstv %s902_s19  ;;  %965 = vmatprep.subr.bf16.mxu1 %v1340_v3  ;;  %s1758_s12 = sld [smem:[#allocation23_spill]]  ;;  %s911_s19 = sshll.u32 %s716_s0, 7 }
  0xb1   : > { %p1760_p11 = scmp.ne.s32.totalorder %s1752_s21, 0  ;;  %s1345_s4 = smov [#allocation13]  }
  0xb2   : > { %v510_v22 = vstv %s509_s17  ;;  %s720_s17 = sshll.u32 %s405_s15, 4  ;;  %s1225_s20 = sshll.u32 %s1345_s4, 4  ;;  %s1669_s17 = int_to_ptr.vmem [resolvable:$true] %s720_s17  ;;  %s1226_s20 = int_to_ptr.vmem [resolvable:$false] %s1225_s20 }
  0xb3   : > { %936 = vmatmul.mubr.msk.f32.vlgmr.msra.gmra.mrb[0].mxu0 %vm422_vm1, %v1640_v8  ;;  %v520_v26 = vstv %s519_s1  ;;  %s1221_s28 = scalar_lea.vmem %s1669_s17, 128  ;;  %s1227_s7 = scalar_lea.vmem %s1226_s20, 256 }
  0xb4   : > { %p1222_p10 = scmp.ne.s32.totalorder %s1669_s17, %s1221_s28  ;;  %p1228_p13 = scmp.lt.s32.totalorder %s1669_s17, %s1226_s20 }
  0xb5   : > { %s1667_s18 = scalar_lea.hbm %s1759_s16, %s911_s19  ;;  %p1229_p0 = scmp.lt.s32.totalorder %s1227_s7, %s1221_s28 }
  0xb6   : > { %v908_v48 = vld [vmem:[%s1758_s12] ss:$0 sm:$0xff]  ;;  %p1223_p2 = pnand %p1222_p10, %p1760_p11 }
  0xb7   : > { %p1230_p4 = por %p1229_p0, %p1228_p13 }
  0xb8   : > { %p1224_p7 = pneg %p1223_p2 }
  0xba   : > { %p1231_p1 = pnand %p1230_p4, %p1224_p7 }
 0x186   : > { %v492_v12 = vpop.f32.mrb[0].mxu0 }
 0x187   : > { %v498_v13 = vadd.f32 %v497_v10, %v492_v12  ;;  %v501_v14 = vadd.f32 %v500_v11, %v492_v12  ;;  %v937_v15 = vpop.f32.mrb[1].mxu0 }
 0x189   : > { %v903_v16 = vmul.f32 -1.442695, %v498_v13  ;;  %v905_v17 = vmul.f32 -1.442695, %v501_v14 }
 0x18b   : > { %1099 = vpow2.f32 %v903_v16 }
 0x18c   : > { %1101 = vpow2.f32 %v905_v17 }
 0x195   : > { %v1100_v18 = vpop.eup %1099 }
 0x196   : > { %v1102_v19 = vpop.eup %1101  ;;  %v505_v20 = vadd.f32 1.0, %v1100_v18 }
 0x197   : > { %v515_v21 = vadd.f32 1.0, %v1102_v19 }
 0x198   : > { %1103 = vrcp.f32 %v505_v20 }
 0x199   : > { %1105 = vrcp.f32 %v515_v21 }
 0x1a2   : > { %v1104_v23 = vpop.eup %1103 }
 0x1a3   : > { %v511_v24 = vmul.f32 %v1104_v23, %v510_v22  ;;  %v1106_v25 = vpop.eup %1105 }
 0x1a4   : > { %v521_v27 = vmul.f32 %v1106_v25, %v520_v26 }
 0x1a5   : > { %527 = vperm.xlu0 %1097, %v511_v24  }
 0x1a9   : > { %1098 = vset.pattern.permute.xlu0 %v1344_v28 }
 0x1aa   : > { %532 = vperm.xlu0 %1098, %v521_v27  }
 0x224   : > { %v528_v34 = vpop.permute.xlu0 %527 }
 0x229   : > { %v533_v35 = vpop.permute.xlu0 %532 }
 0x22a   : > { %v535_v36 = vsel %vm524_vm2, %v528_v34, %v533_v35 }
 0x22b   : > { %v536_v37 = vmul.f32 %v535_v36, %v492_v12 }
 0x22d   : > { %538 = vst.msk [vmem:[#allocation2] sm:$0xff] %vm537_vm3, %v536_v37 }
 0x234   : > { %v543_v43 = vld [vmem:[#allocation2] sm:$0xff] }
 0x235   : > { %943 = vmatmul.mubr.msk.f32.vlgmr.msra.gmra.mrb[0].mxu1 %vm537_vm3, %v543_v43 }
 0x236   : > { %967 = vmatpush3.bf16.msra.mxu1 %v966_v40  ;;  %953 = vmatprep.mubr.msk.f32.mxu1 %vm1341_vm0, %v1342_v6 }
 0x237   : > { %968 = vmatprep.subr.bf16.mxu1 %v1340_v3 }
 0x23a   : > { %970 = vmatpush3.bf16.msra.mxu1 %v969_v44 }
 0x23d   : > { %954 = vmatmul.mubr.msk.f32.vlgmr.msra.gmra.mrb[2].mxu1 %vm422_vm1, %v1640_v8 }
 0x308   : > { %v616_v45 = vpop.f32.mrb[0].mxu1 }
 0x309   : > { %v944_v46 = vpop.f32.mrb[1].mxu1 }
 0x310   : > { %v690_v47 = vpop.f32.mrb[2].mxu1 }
 0x311   : > { %v691_v49 = vadd.f32 %v690_v47, %v616_v45  ;;  %v955_v50 = vpop.f32.mrb[3].mxu1 }
 0x313   : > { %v701_v51 = vadd.f32 %v908_v48, %v691_v49 }
 0x315   : > { %702 = vst [vmem:[%s405_s15] sm:$0xff] %v701_v51 }
 0x316   : > { %1234 = shalt.err (!%p1231_p1)
}
 0x317   : > { %s1235_s6 = scalar_lea.hbm %s1667_s18, 128  ;;  %s1239_s13 = scalar_lea.hbm %s1759_s16, 512 }
 0x318   : > { %p1236_p6 = scmp.ne.s32.totalorder %s1667_s18, %s1235_s6  ;;  %p1240_p12 = scmp.lt.u32.totalorder %s1667_s18, %s1759_s16 }
 0x319   : > { %p1241_p8 = scmp.lt.u32.totalorder %s1239_s13, %s1235_s6  ;;  %p1243_p10 = scmp.lt.u32.totalorder %s1235_s6, %s1667_s18 }
 0x31a   : > { %p1237_p5 = pnand %p1236_p6, %p1760_p11 }
 0x31b   : > { %p1242_p3 = por %p1241_p8, %p1240_p12 }
 0x31c   : > { %p1238_p9 = pneg %p1237_p5 }
 0x31d   : > { %p1244_p2 = por %p1243_p10, %p1242_p3 }
 0x31f   : > { %p1245_p7 = pnand %p1244_p2, %p1238_p9 }
 0x321   : > { %1248 = shalt.err (!%p1245_p7)
}
 0x322   : > { %989 = dma.vmem_to_hbm [thread:$0]  (%p1760_p11), %s1669_s17, 128, %s1667_s18, %s704_s27  }
 0x323 PF: > { %p1021_p13 = scmp.ge.s32.totalorder %s1331_s8, 2  ;;  %s732_s19 = sand.u32 1, %s1303_s24  }
 0x324   : > { %p1761_p0 = scmp.ne.s32.totalorder %s1754_s10, 0  ;;  %s733_s15 = scalar_lea.sflag [#allocation5], %s732_s19 }
 0x326   : > { %p1009_p4 = pnand %p1021_p13, %p1761_p0 }
 0x328   : > { %1298 = dma.done.wait (!%p1009_p4), %s733_s15, 128  }
 0x329   : > { %1300 = vsyncadd (!%p1009_p4), %s733_s15, 4294967168  ;;  %s26_s8 = sadd.s32 1, %s1331_s8   ;;  %s1762_s24 = smov %s1307_s25 }
 0x32a   : > { %p23_p1 = scmp.ge.s32.totalorder %s26_s8, 6   ;;  %s1763_s25 = smov %s1311_s26 }
 0x32b   : > { %s1764_s26 = smov %s1566_s11  ;;  %s1765_s27 = smov %s1323_s29 }
 0x32c   : > { %s1766_s28 = smov %s1327_s30  ;;  %s1767_s29 = smov %s1770_s14 }
 0x32d   : > { %s1768_s30 = smov %s1774_s23  ;;  %25 = sbr.rel (!%p23_p1) target bundleno = 17 (0x11), region = 122 }
 0x334   :  { %738 = vsyncpa [#allocation4], 1 }
 0x335   :  { %740 = vsyncpa [#allocation4 + $0x1], 1 }
 0x336   :  { %741 = vsyncpa [#allocation11], 1 }
 0x337   :  { %742 = vsyncpa [#allocation5], 1 }
 0x338   :  { %744 = vsyncpa [#allocation5 + $0x1], 1 }
 0x339   :  { %745 = vsyncpa [#allocation6], 1 }
 0x33a   :  { %747 = vsyncpa [#allocation6 + $0x1], 1 }
 0x33b   :  { %748 = vsyncpa [#allocation7], 1 }
 0x33c   :  { %750 = vsyncpa [#allocation7 + $0x1], 1 }

</bundles_post_ra>
